<compile_context>
chip_gen: v7x
topology: tpu7x:2x2x1
jax: 0.10.0
libtpu: 0.0.40
codegen_flags: <defaults>
</compile_context>

<pallas_src>
import jax
import jax.numpy as jnp
from jax.experimental import pallas as pl
from jax.experimental.pallas import tpu as pltpu

INPUT_DIM = 20
HIDDEN_DIM = 100
OUTPUT_DIM = 10
NUM_HIDDEN_LAYERS = 2  # -> 3 Linear layers total

PAD = 128  # hidden dim padded to lane width (VMEM-internal only)


def _round_up(x, m):
    return (x + m - 1) // m * m


def _choose_tile(batch):
    """Batch rows per grid step."""
    if batch < 256:
        # Single step; just satisfy the 8-row sublane constraint.
        return _round_up(batch, 8)
    # Large batch: big tiles (low per-step overhead), but guarantee >= 2
    # roughly balanced steps so both v7x TensorCores get work.
    half = _round_up((batch + 1) // 2, 8)
    return min(512, half)


def mlp_kernel(x_ref, w1_ref, w2_ref, w3_ref, b12_ref, b3_ref, o_ref):
    # x_ref:  (TM, 20)          w1_ref: (20, 128)
    # w2_ref: (128, 128)        w3_ref: (128, 10)
    # b12_ref:(2, 128)          b3_ref: (1, 10)
    # o_ref:  (TM, 10)
    x = x_ref[...]

    # Layer 1: Linear + ReLU  (padded hidden lanes stay exactly 0)
    h = jnp.dot(x, w1_ref[...], preferred_element_type=jnp.float32)
    h = jnp.maximum(h + b12_ref[0:1, :], 0.0)

    # Layer 2: Linear + ReLU
    h = jnp.dot(h, w2_ref[...], preferred_element_type=jnp.float32)
    h = jnp.maximum(h + b12_ref[1:2, :], 0.0)

    # Layer 3: Linear + Sigmoid (only the 10 real output lanes)
    z = jnp.dot(h, w3_ref[...], preferred_element_type=jnp.float32)
    o_ref[...] = jax.nn.sigmoid(z + b3_ref[...])


def init_params(key):
    """Deterministic synthetic parameters, PyTorch-style uniform init,
    weights stored as [in_features, out_features] (transposed vs. torch)."""
    dims = [INPUT_DIM] + [HIDDEN_DIM] * NUM_HIDDEN_LAYERS + [OUTPUT_DIM]
    params = []
    for fan_in, fan_out in zip(dims[:-1], dims[1:]):
        kw, kb, key = jax.random.split(key, 3)
        bound = 1.0 / (fan_in ** 0.5)
        w = jax.random.uniform(kw, (fan_in, fan_out), jnp.float32, -bound, bound)
        b = jax.random.uniform(kb, (1, fan_out), jnp.float32, -bound, bound)
        params += [w, b]
    return tuple(params)


def pack_params(params):
    """Zero-pad only the *hidden* dims to 128 (exact math: padded rows/cols
    and biases are 0 -> padded hidden activations are relu(0)=0 and never
    contribute).  Input K (20) and output N (10) stay at natural width so
    their HBM footprint is unchanged.  Done once, outside the per-call path."""
    w1, b1, w2, b2, w3, b3 = params

    W1 = jnp.zeros((INPUT_DIM, PAD), jnp.float32).at[:, :HIDDEN_DIM].set(w1)
    W2 = jnp.zeros((PAD, PAD), jnp.float32).at[:HIDDEN_DIM, :HIDDEN_DIM].set(w2)
    W3 = jnp.zeros((PAD, OUTPUT_DIM), jnp.float32).at[:HIDDEN_DIM, :].set(w3)

    B12 = jnp.zeros((2, PAD), jnp.float32)
    B12 = B12.at[0, :HIDDEN_DIM].set(b1.reshape(-1))
    B12 = B12.at[1, :HIDDEN_DIM].set(b2.reshape(-1))
    B3 = b3.reshape(1, OUTPUT_DIM).astype(jnp.float32)
    return W1, W2, W3, B12, B3


def deep_binary_net_forward(x, packed_params):
    W1, W2, W3, B12, B3 = packed_params
    batch = x.shape[0]

    tm = _choose_tile(batch)
    batch_pad = _round_up(batch, tm)
    if batch_pad != batch:
        # Cheap: only 20-wide rows, no 128-lane slab materialized.
        x = jnp.pad(x, ((0, batch_pad - batch), (0, 0)))

    n_steps = batch_pad // tm

    # Advisory cost so XLA can overlap neighboring ops with the custom call.
    flops = 2 * batch_pad * (INPUT_DIM * PAD + PAD * PAD + PAD * OUTPUT_DIM)
    bytes_accessed = 4 * (
        batch_pad * INPUT_DIM            # x
        + INPUT_DIM * PAD + PAD * PAD    # W1, W2
        + PAD * OUTPUT_DIM               # W3
        + 2 * PAD + OUTPUT_DIM           # biases
        + batch_pad * OUTPUT_DIM         # out
    )
    cost = pl.CostEstimate(
        flops=flops,
        transcendentals=batch_pad * OUTPUT_DIM,
        bytes_accessed=bytes_accessed,
    )

    out = pl.pallas_call(
        mlp_kernel,
        out_shape=jax.ShapeDtypeStruct((batch_pad, OUTPUT_DIM), jnp.float32),
        grid=(n_steps,),
        in_specs=[
            pl.BlockSpec((tm, INPUT_DIM), lambda i: (i, 0)),       # x: tiled over batch, natural width
            pl.BlockSpec((INPUT_DIM, PAD), lambda i: (0, 0)),      # W1: resident
            pl.BlockSpec((PAD, PAD), lambda i: (0, 0)),            # W2: resident
            pl.BlockSpec((PAD, OUTPUT_DIM), lambda i: (0, 0)),     # W3: resident, narrow N
            pl.BlockSpec((2, PAD), lambda i: (0, 0)),              # biases 1,2: resident
            pl.BlockSpec((1, OUTPUT_DIM), lambda i: (0, 0)),       # bias 3: resident
        ],
        out_specs=pl.BlockSpec((tm, OUTPUT_DIM), lambda i: (i, 0)),
        compiler_params=pltpu.CompilerParams(
            dimension_semantics=("parallel",),  # shards batch steps across v7x TCs
            vmem_limit_bytes=16 << 20,          # ample headroom for TM=512 tiles
        ),
        cost_estimate=cost,
    )(x, W1, W2, W3, B12, B3)

    return out[:batch] if batch_pad != batch else out


def reference_forward(x, params):
    w1, b1, w2, b2, w3, b3 = params
    h = jnp.maximum(x @ w1 + b1, 0.0)
    h = jnp.maximum(h @ w2 + b2, 0.0)
    return jax.nn.sigmoid(h @ w3 + b3)


if __name__ == "__main__":
    key = jax.random.PRNGKey(0)
    kx, kx2, kp = jax.random.split(key, 3)

    params = init_params(kp)
    packed = pack_params(params)

    # Small batch (single grid step).
    batch = 8
    x = jax.random.normal(kx, (batch, INPUT_DIM), dtype=jnp.float32)
    out = jax.block_until_ready(deep_binary_net_forward(x, packed))
    ref = reference_forward(x, params)
    assert out.shape == (batch, OUTPUT_DIM)
    assert jnp.allclose(out, ref, atol=1e-5, rtol=1e-5)

    # Non-multiple batch: exercises the 2-step balanced grid + row padding path.
    batch2 = 300
    x2 = jax.random.normal(kx2, (batch2, INPUT_DIM), dtype=jnp.float32)
    out2 = jax.block_until_ready(deep_binary_net_forward(x2, packed))
    ref2 = reference_forward(x2, params)
    assert out2.shape == (batch2, OUTPUT_DIM)
    assert jnp.allclose(out2, ref2, atol=1e-5, rtol=1e-5)

    print("KERNEL_OK")
</pallas_src>

<mosaic_0001>
module attributes {stable_mosaic.version = 11 : i64} {
  func.func @mlp_kernel(%arg0: i32, %arg1: memref<8x20xf32, #tpu.memory_space<vmem>>, %arg2: memref<20x128xf32, #tpu.memory_space<vmem>>, %arg3: memref<128x128xf32, #tpu.memory_space<vmem>>, %arg4: memref<128x10xf32, #tpu.memory_space<vmem>>, %arg5: memref<2x128xf32, #tpu.memory_space<vmem>>, %arg6: memref<1x10xf32, #tpu.memory_space<vmem>>, %arg7: memref<8x10xf32, #tpu.memory_space<vmem>>) attributes {dimension_semantics = [#tpu.dimension_semantics<parallel>], iteration_bounds = array<i64: 1>, scalar_prefetch = 0 : i64, scratch_operands = 0 : i64, tpu.core_type = #tpu.core_type<tc>, window_params = [{transform_indices = @transform_0, window_bounds = array<i64: 8, 20>}, {pipeline_mode = #tpu.pipeline_mode<synchronous>, transform_indices = @transform_1, window_bounds = array<i64: 20, 128>}, {pipeline_mode = #tpu.pipeline_mode<synchronous>, transform_indices = @transform_2, window_bounds = array<i64: 128, 128>}, {pipeline_mode = #tpu.pipeline_mode<synchronous>, transform_indices = @transform_3, window_bounds = array<i64: 128, 10>}, {pipeline_mode = #tpu.pipeline_mode<synchronous>, transform_indices = @transform_4, window_bounds = array<i64: 2, 128>}, {pipeline_mode = #tpu.pipeline_mode<synchronous>, transform_indices = @transform_5, window_bounds = array<i64: 1, 10>}, {transform_indices = @transform_6, window_bounds = array<i64: 8, 10>}]} {
    %c0 = arith.constant 0 : index
    %c0_0 = arith.constant 0 : index
    %0 = vector.load %arg1[%c0, %c0_0] : memref<8x20xf32, #tpu.memory_space<vmem>>, vector<8x20xf32>
    %c0_1 = arith.constant 0 : index
    %c0_2 = arith.constant 0 : index
    %1 = vector.load %arg2[%c0_1, %c0_2] : memref<20x128xf32, #tpu.memory_space<vmem>>, vector<20x128xf32>
    %cst = arith.constant dense<0.000000e+00> : vector<8x128xf32>
    %2 = tpu.matmul %0, %1, %cst {dimension_numbers = #tpu.dot_dimension_numbers<[1], [0], [0], [1], [0, 0, 1, 1], [], []>} : vector<8x20xf32>, vector<20x128xf32>, vector<8x128xf32> -> vector<8x128xf32>
    %c0_3 = arith.constant 0 : index
    %c0_4 = arith.constant 0 : index
    %3 = vector.load %arg5[%c0_3, %c0_4] : memref<2x128xf32, #tpu.memory_space<vmem>>, vector<1x128xf32>
    %4 = vector.broadcast %3 : vector<1x128xf32> to vector<8x128xf32>
    %5 = arith.addf %2, %4 : vector<8x128xf32>
    %cst_5 = arith.constant 0.000000e+00 : f32
    %6 = vector.broadcast %cst_5 : f32 to vector<8x128xf32>
    %7 = arith.maximumf %5, %6 : vector<8x128xf32>
    %c0_6 = arith.constant 0 : index
    %c0_7 = arith.constant 0 : index
    %8 = vector.load %arg3[%c0_6, %c0_7] : memref<128x128xf32, #tpu.memory_space<vmem>>, vector<128x128xf32>
    %cst_8 = arith.constant dense<0.000000e+00> : vector<8x128xf32>
    %9 = tpu.matmul %7, %8, %cst_8 {dimension_numbers = #tpu.dot_dimension_numbers<[1], [0], [0], [1], [0, 0, 1, 1], [], []>} : vector<8x128xf32>, vector<128x128xf32>, vector<8x128xf32> -> vector<8x128xf32>
    %c1 = arith.constant 1 : index
    %c0_9 = arith.constant 0 : index
    %10 = vector.load %arg5[%c1, %c0_9] : memref<2x128xf32, #tpu.memory_space<vmem>>, vector<1x128xf32>
    %11 = vector.broadcast %10 : vector<1x128xf32> to vector<8x128xf32>
    %12 = arith.addf %9, %11 : vector<8x128xf32>
    %cst_10 = arith.constant 0.000000e+00 : f32
    %13 = vector.broadcast %cst_10 : f32 to vector<8x128xf32>
    %14 = arith.maximumf %12, %13 : vector<8x128xf32>
    %c0_11 = arith.constant 0 : index
    %c0_12 = arith.constant 0 : index
    %15 = vector.load %arg4[%c0_11, %c0_12] : memref<128x10xf32, #tpu.memory_space<vmem>>, vector<128x10xf32>
    %cst_13 = arith.constant dense<0.000000e+00> : vector<8x10xf32>
    %16 = tpu.matmul %14, %15, %cst_13 {dimension_numbers = #tpu.dot_dimension_numbers<[1], [0], [0], [1], [0, 0, 1, 1], [], []>} : vector<8x128xf32>, vector<128x10xf32>, vector<8x10xf32> -> vector<8x10xf32>
    %c0_14 = arith.constant 0 : index
    %c0_15 = arith.constant 0 : index
    %17 = vector.load %arg6[%c0_14, %c0_15] : memref<1x10xf32, #tpu.memory_space<vmem>>, vector<1x10xf32>
    %18 = vector.broadcast %17 : vector<1x10xf32> to vector<8x10xf32>
    %19 = arith.addf %16, %18 : vector<8x10xf32>
    %20 = arith.negf %19 : vector<8x10xf32>
    %21 = math.exp %20 : vector<8x10xf32>
    %cst_16 = arith.constant 1.000000e+00 : f32
    %22 = vector.broadcast %cst_16 : f32 to vector<8x10xf32>
    %23 = arith.addf %22, %21 : vector<8x10xf32>
    %24 = arith.divf %22, %23 : vector<8x10xf32>
    %c0_17 = arith.constant 0 : index
    %c0_18 = arith.constant 0 : index
    %25 = vector.load %arg7[%c0_17, %c0_18] : memref<8x10xf32, #tpu.memory_space<vmem>>, vector<8x10xf32>
    tpu.vector_store %arg7[%c0_17, %c0_18], %24 {strides = array<i32>} : memref<8x10xf32, #tpu.memory_space<vmem>>, vector<8x10xf32>,
    return
  }
  func.func @transform_0(%arg0: i32) -> (i32, i32) {
    %c0_i32 = arith.constant 0 : i32
    %c0_i32_0 = arith.constant 0 : i32
    return %arg0, %c0_i32 : i32, i32
  }
  func.func @transform_1(%arg0: i32) -> (i32, i32) {
    %c0_i32 = arith.constant 0 : i32
    %c0_i32_0 = arith.constant 0 : i32
    %c0_i32_1 = arith.constant 0 : i32
    return %c0_i32, %c0_i32_0 : i32, i32
  }
  func.func @transform_2(%arg0: i32) -> (i32, i32) {
    %c0_i32 = arith.constant 0 : i32
    %c0_i32_0 = arith.constant 0 : i32
    %c0_i32_1 = arith.constant 0 : i32
    return %c0_i32, %c0_i32_0 : i32, i32
  }
  func.func @transform_3(%arg0: i32) -> (i32, i32) {
    %c0_i32 = arith.constant 0 : i32
    %c0_i32_0 = arith.constant 0 : i32
    %c0_i32_1 = arith.constant 0 : i32
    return %c0_i32, %c0_i32_0 : i32, i32
  }
  func.func @transform_4(%arg0: i32) -> (i32, i32) {
    %c0_i32 = arith.constant 0 : i32
    %c0_i32_0 = arith.constant 0 : i32
    %c0_i32_1 = arith.constant 0 : i32
    return %c0_i32, %c0_i32_0 : i32, i32
  }
  func.func @transform_5(%arg0: i32) -> (i32, i32) {
    %c0_i32 = arith.constant 0 : i32
    %c0_i32_0 = arith.constant 0 : i32
    %c0_i32_1 = arith.constant 0 : i32
    return %c0_i32, %c0_i32_0 : i32, i32
  }
  func.func @transform_6(%arg0: i32) -> (i32, i32) {
    %c0_i32 = arith.constant 0 : i32
    %c0_i32_0 = arith.constant 0 : i32
    return %arg0, %c0_i32 : i32, i32
  }
}

</mosaic_0001>

<bundles_post_ra>
// kernel: tpu_custom_call.1
= control target key start
LH: loop header
LB: loop body
LE: loop exit
PB: predicated region body
PF: predicated region fallthrough
CT: control target
= control target key end

     0   :  { %11 = vsyncpa [#allocation3], 0  ;;  %s761_s0 = inlined_call_operand.vmem [shape: f32[8,20], index: 0, kind: input, shape index: {}]   ;;  %s762_s1 = inlined_call_operand.hbm [shape: f32[20,128], index: 1, kind: input, shape index: {}]   ;;  %s763_s2 = inlined_call_operand.vmem [shape: f32[128,128], index: 2, kind: input, shape index: {}]   ;;  %s764_s3 = inlined_call_operand.vmem [shape: f32[128,10], index: 3, kind: input, shape index: {}]   ;;  %s765_s4 = inlined_call_operand.vmem [shape: f32[2,128], index: 4, kind: input, shape index: {}]   ;;  %s766_s5 = inlined_call_operand.vmem [shape: f32[1,10], index: 5, kind: input, shape index: {}]   ;;  %s767_s6 = inlined_call_operand.hbm [shape: f32[8,10], index: 6, kind: output, shape index: {}]  }
   0x1   :  { %12 = vsyncpa [#allocation4], 0  ;;  %s567_s21 = smov [#allocation2]   ;;  %s519_s25 = scalar_lea.hbm %s762_s1, 384 }
   0x2   :  { %s20_s22 = sshll.u32 %s567_s21, 4  ;;  %p520_p0 = scmp.ne.s32.totalorder %s762_s1, %s519_s25  ;;  %s21_s22 = int_to_ptr.vmem [resolvable:$true] %s20_s22 }
   0x3   :  { %p523_p1 = scmp.lt.u32.totalorder %s519_s25, %s762_s1 }
   0x5   :  { %p525_p2 = pnand %p523_p1, %p520_p0 }
   0x7   :  { %528 = shalt.err (!%p525_p2)
}
   0x8   :  { %s529_s30 = scalar_lea.vmem %s21_s22, 384  ;;  %p534_p4 = scmp.lt.s32.totalorder %s21_s22, %s21_s22 }
   0x9   :  { %p530_p3 = scmp.ne.s32.totalorder %s21_s22, %s529_s30  ;;  %p535_p5 = scmp.lt.s32.totalorder %s529_s30, %s529_s30 }
   0xb   :  { %p536_p6 = por %p535_p5, %p534_p4 }
   0xd   :  { %p537_p7 = pnand %p536_p6, %p530_p3 }
   0xf   :  { %540 = shalt.err (!%p537_p7)
}
  0x10   :  { %s568_s7 = smov 128   ;;  %s569_s8 = smov 8  }
  0x11   :  { %26 = dma.hbm_to_vmem [thread:$0]  %s762_s1, 384, %s21_s22, [#allocation3], %s568_s7, %s568_s7, %s569_s8  }
  0x12   :  { %563 = dma.done.wait [#allocation3], 384  }
  0x13   :  { %564 = vsyncadd [#allocation3], 4294966912  ;;  %v570_v0 = vmov 0.0|0.0   ;;  %vm571_vm0 = vmmov 0   ;;  %v572_v1 = vmov 0.0   ;;  %v39_v2 = vld [vmem:[#allocation2] sm:$0xff] }
  0x14   :  { %457 = vmatprep.subr.bf16.mxu0 %v570_v0  ;;  %384 = vmatprep.mubr.msk.f32.mxu0 %vm571_vm0, %v572_v1  ;;  %v40_v3 = vld [vmem:[#allocation2 + $0x8] sm:$0xff]  ;;  %v126_v5 = vld [vmem:[%s763_s2] sm:$0xff]  ;;  %v128_v8 = vld [vmem:[%s763_s2 + $0x10] sm:$0xff]  ;;  %vm51_vm1 = vcmask 1043456   ;;  %vm47_vm2 = vcmask 162816   ;;  %vm317_vm3 = vcmask 80896  }
  0x15   :  { %460 = vmatprep.subr.bf16.mxu1 %v570_v0  ;;  %419 = vmatprep.mubr.msk.f32.mxu1 %vm571_vm0, %v572_v1  ;;  %v458_v4 = vpack.c.bf16 %v40_v3, %v39_v2  ;;  %v127_v6 = vld [vmem:[%s763_s2 + $0x8] sm:$0xff]  ;;  %v129_v9 = vld [vmem:[%s763_s2 + $0x18] sm:$0xff]  ;;  %v41_v10 = vld [vmem:[#allocation2 + $0x10] sm:$0xf] }
  0x16   :  { %v461_v7 = vpack.c.bf16 %v127_v6, %v126_v5  ;;  %v464_v11 = vpack.c.bf16 %v129_v9, %v128_v8  ;;  %v38_v12 = vld [vmem:[%s761_s0] sm:$0xff]  ;;  %v131_v14 = vld [vmem:[%s763_s2 + $0x28] sm:$0xff]  ;;  %v132_v16 = vld [vmem:[%s763_s2 + $0x30] sm:$0xff] }
  0x17   :  { %459 = vmatpush3.bf16.msra.mxu0 %v458_v4  ;;  %v130_v13 = vld [vmem:[%s763_s2 + $0x20] sm:$0xff]  ;;  %v133_v17 = vld [vmem:[%s763_s2 + $0x38] sm:$0xff]  ;;  %v135_v20 = vld [vmem:[%s763_s2 + $0x48] sm:$0xff] }
  0x18   :  { %382 = vmatprep.subr.mxu0 %v572_v1  ;;  %462 = vmatpush3.bf16.msra.mxu1 %v461_v7  ;;  %v467_v15 = vpack.c.bf16 %v131_v14, %v130_v13  ;;  %v470_v18 = vpack.c.bf16 %v133_v17, %v132_v16  ;;  %v134_v19 = vld [vmem:[%s763_s2 + $0x40] sm:$0xff]  ;;  %v136_v22 = vld [vmem:[%s763_s2 + $0x50] sm:$0xff]  ;;  %v137_v23 = vld [vmem:[%s763_s2 + $0x58] sm:$0xff] }
  0x19   :  { %463 = vmatprep.subr.bf16.mxu1 %v570_v0  ;;  %v473_v21 = vpack.c.bf16 %v135_v20, %v134_v19  ;;  %v476_v24 = vpack.c.bf16 %v137_v23, %v136_v22  ;;  %v138_v25 = vld [vmem:[%s763_s2 + $0x60] sm:$0xff]  ;;  %v139_v26 = vld [vmem:[%s763_s2 + $0x68] sm:$0xff]  ;;  %v140_v28 = vld [vmem:[%s763_s2 + $0x70] sm:$0xff] }
  0x1a   :  { %v479_v27 = vpack.c.bf16 %v139_v26, %v138_v25  ;;  %v141_v29 = vld [vmem:[%s763_s2 + $0x78] sm:$0xff]  ;;  %v218_v31 = vld [vmem:[%s764_s3] sm:$0xff]  ;;  %v219_v32 = vld [vmem:[%s764_s3 + $0x8] sm:$0xff] }
  0x1b   :  { %383 = vmatpush3.msk.msra.mxu0 %vm51_vm1, %v41_v10  ;;  %v482_v30 = vpack.c.bf16 %v141_v29, %v140_v28  ;;  %v220_v33 = vld [vmem:[%s764_s3 + $0x10] sm:$0xff]  ;;  %v485_v34 = vpack.c.bf16 %v219_v32, %v218_v31  ;;  %v221_v35 = vld [vmem:[%s764_s3 + $0x18] sm:$0xff]  ;;  %v222_v37 = vld [vmem:[%s764_s3 + $0x20] sm:$0xff] }
  0x1c   :  { %385 = vmatmul.mubr.msk.f32.vlgmr.msra.gmra.mrb[0].mxu0 %vm47_vm2, %v38_v12  ;;  %465 = vmatpush3.bf16.msra.mxu1 %v464_v11  ;;  %v488_v36 = vpack.c.bf16 %v221_v35, %v220_v33  ;;  %v223_v38 = vld [vmem:[%s764_s3 + $0x28] sm:$0xff]  ;;  %v224_v40 = vld [vmem:[%s764_s3 + $0x30] sm:$0xff]  ;;  %v225_v41 = vld [vmem:[%s764_s3 + $0x38] sm:$0xff] }
  0x1d   :  { %466 = vmatprep.subr.bf16.mxu1 %v570_v0  ;;  %484 = vmatprep.subr.bf16.mxu0 %v570_v0  ;;  %v491_v39 = vpack.c.bf16 %v223_v38, %v222_v37  ;;  %v494_v42 = vpack.c.bf16 %v225_v41, %v224_v40  ;;  %v226_v43 = vld [vmem:[%s764_s3 + $0x40] sm:$0xff]  ;;  %v227_v44 = vld [vmem:[%s764_s3 + $0x48] sm:$0xff]  ;;  %v228_v46 = vld [vmem:[%s764_s3 + $0x50] sm:$0xff] }
  0x1e   :  { %454 = vmatprep.mubr.msk.f32.mxu0 %vm571_vm0, %v572_v1  ;;  %486 = vmatpush3.bf16.msra.mxu0 %v485_v34  ;;  %v497_v45 = vpack.c.bf16 %v227_v44, %v226_v43  ;;  %v229_v47 = vld [vmem:[%s764_s3 + $0x58] sm:$0xff]  ;;  %v230_v49 = vld [vmem:[%s764_s3 + $0x60] sm:$0xff]  ;;  %v231_v50 = vld [vmem:[%s764_s3 + $0x68] sm:$0xff] }
  0x1f   :  { %487 = vmatprep.subr.bf16.mxu0 %v570_v0  ;;  %v500_v48 = vpack.c.bf16 %v229_v47, %v228_v46  ;;  %v503_v51 = vpack.c.bf16 %v231_v50, %v230_v49  ;;  %v334_v52 = vld [vmem:[%s765_s4] ss:$0 sm:$0xff]  ;;  %v232_v57 = vld [vmem:[%s764_s3 + $0x70] sm:$0xff]  ;;  %v233_v58 = vld [vmem:[%s764_s3 + $0x78] sm:$0xff]  ;;  %s573_s3 = smov [#allocation5]  }
  0x20   :  { %468 = vmatpush3.bf16.msra.mxu1 %v467_v15  ;;  %v506_v59 = vpack.c.bf16 %v233_v58, %v232_v57  ;;  %v337_v60 = vld [vmem:[%s765_s4 + $0x1] ss:$0 sm:$0xff]  ;;  %v338_v1 = vld [vmem:[%s766_s5] ss:$0 sm:$0xff]  ;;  %s325_s27 = sshll.u32 %s573_s3, 4  ;;  %s326_s27 = int_to_ptr.vmem [resolvable:$true] %s325_s27 }
  0x21   :  { %469 = vmatprep.subr.bf16.mxu1 %v570_v0  ;;  %s541_s4 = scalar_lea.vmem %s326_s27, 128  ;;  %p546_p9 = scmp.lt.s32.totalorder %s326_s27, %s326_s27 }
  0x22   :  { %489 = vmatpush3.bf16.msra.mxu0 %v488_v36  ;;  %p542_p8 = scmp.ne.s32.totalorder %s326_s27, %s541_s4  ;;  %p547_p10 = scmp.lt.s32.totalorder %s541_s4, %s541_s4 }
  0x23   :  { %490 = vmatprep.subr.bf16.mxu0 %v570_v0 }
  0x24   :  { %471 = vmatpush3.bf16.msra.mxu1 %v470_v18  ;;  %p548_p11 = por %p547_p10, %p546_p9 }
  0x25   :  { %472 = vmatprep.subr.bf16.mxu1 %v570_v0 }
  0x26   :  { %492 = vmatpush3.bf16.msra.mxu0 %v491_v39  ;;  %p549_p12 = pnand %p548_p11, %p542_p8 }
  0x27   :  { %493 = vmatprep.subr.bf16.mxu0 %v570_v0 }
  0x28   :  { %474 = vmatpush3.bf16.msra.mxu1 %v473_v21 }
  0x29   :  { %475 = vmatprep.subr.bf16.mxu1 %v570_v0 }
  0x2a   :  { %495 = vmatpush3.bf16.msra.mxu0 %v494_v42 }
  0x2b   :  { %496 = vmatprep.subr.bf16.mxu0 %v570_v0 }
  0x2c   :  { %477 = vmatpush3.bf16.msra.mxu1 %v476_v24 }
  0x2d   :  { %478 = vmatprep.subr.bf16.mxu1 %v570_v0 }
  0x2e   :  { %498 = vmatpush3.bf16.msra.mxu0 %v497_v45 }
  0x2f   :  { %499 = vmatprep.subr.bf16.mxu0 %v570_v0 }
  0x30   :  { %480 = vmatpush3.bf16.msra.mxu1 %v479_v27 }
  0x31   :  { %481 = vmatprep.subr.bf16.mxu1 %v570_v0 }
  0x32   :  { %501 = vmatpush3.bf16.msra.mxu0 %v500_v48 }
  0x33   :  { %502 = vmatprep.subr.bf16.mxu0 %v570_v0 }
  0x34   :  { %483 = vmatpush3.bf16.msra.mxu1 %v482_v30 }
  0x36   :  { %504 = vmatpush3.bf16.msra.mxu0 %v503_v51 }
  0x37   :  { %505 = vmatprep.subr.bf16.mxu0 %v570_v0 }
  0x3a   :  { %507 = vmatpush3.bf16.msra.mxu0 %v506_v59 }
  0xef   :  { %v121_v53 = vpop.f32.mrb[0].mxu0 }
  0xf0   :  { %v122_v54 = vadd.f32 %v334_v52, %v121_v53  ;;  %v386_v55 = vpop.f32.mrb[1].mxu0 }
  0xf2   :  { %v125_v56 = vmax.f32 %v122_v54, 0.0 }
  0xf4   :  { %420 = vmatmul.mubr.f32.vlgmr.msra.gmra.mrb[0].mxu1 %v125_v56 }
 0x1c7   :  { %v213_v61 = vpop.f32.mrb[0].mxu1 }
 0x1c8   :  { %v214_v62 = vadd.f32 %v337_v60, %v213_v61  ;;  %v421_v63 = vpop.f32.mrb[1].mxu1 }
 0x1ca   :  { %v217_v0 = vmax.f32 %v214_v62, 0.0 }
 0x1cc   :  { %455 = vmatmul.mubr.f32.vlgmr.msra.gmra.mrb[2].mxu0 %v217_v0 }
 0x29f   :  { %v307_v2 = vpop.f32.mrb[2].mxu0 }
 0x2a0   :  { %v308_v3 = vadd.f32 %v338_v1, %v307_v2  ;;  %v456_v4 = vpop.f32.mrb[3].mxu0 }
 0x2a2   :  { %v339_v5 = vmul.f32 -1.442695, %v308_v3 }
 0x2a4   :  { %515 = vpow2.f32 %v339_v5 }
 0x2ae   :  { %v516_v6 = vpop.eup %515 }
 0x2af   :  { %v314_v7 = vadd.f32 1.0, %v516_v6 }
 0x2b1   :  { %517 = vrcp.f32 %v314_v7 }
 0x2bb   :  { %v518_v8 = vpop.eup %517 }
 0x2bc   :  { %318 = vst.msk [vmem:[#allocation5] sm:$0xff] %vm317_vm3, %v518_v8 }
 0x2bd   :  { %552 = shalt.err (!%p549_p12)
}
 0x2be   :  { %s553_s29 = scalar_lea.hbm %s767_s6, 128 }
 0x2bf   :  { %p554_p13 = scmp.ne.s32.totalorder %s767_s6, %s553_s29  ;;  %p557_p0 = scmp.lt.u32.totalorder %s553_s29, %s767_s6 }
 0x2c1   :  { %p559_p1 = pnand %p557_p0, %p554_p13 }
 0x2c3   :  { %562 = shalt.err (!%p559_p1)
}
 0x2c4   :  { %328 = dma.vmem_to_hbm [thread:$0]  %s326_s27, 128, %s767_s6, [#allocation4]  }
 0x2c5   :  { %565 = dma.done.wait [#allocation4], 128  }
 0x2c6   :  { %566 = vsyncadd [#allocation4], 4294967168 }
 0x2c7   :  { %332 = vsyncpa [#allocation3], 1 }
 0x2c8   :  { %333 = vsyncpa [#allocation4], 1 }

</bundles_post_ra>
